<compile_context>
chip_gen: v6e
topology: v6e:2x2x1
jax: 0.10.0
libtpu: 0.0.40
codegen_flags: <defaults>
</compile_context>

<pallas_src>
import jax
import jax.numpy as jnp
import numpy as np
from jax import lax
from jax.experimental import pallas as pl
from jax.experimental.pallas import tpu as pltpu


def _lstm_critic_kernel(x_ref, h0_ref, c0_ref, wih_ref, whh_ref, b_ref,
                        scale_ref, off_ref, wout_ref, bout_ref,
                        v_ref, hn_ref, cn_ref,
                        gx_scr, y_scr):
    """Single-invocation LSTM + value head.

    x_ref:     (T*Bp, D)   time-major flattened inputs (batch pre-padded to Bp)
    h0_ref:    (Bp, H)     initial hidden state
    c0_ref:    (Bp, H)     initial cell state
    wih_ref:   (D, 4H)     input->gates weight (pre-transposed, i/f/o cols *0.5)
    whh_ref:   (H, 4H)     hidden->gates weight (pre-transposed, i/f/o cols *0.5)
    b_ref:     (1, 4H)     fused gate bias (b_ih + b_hh, i/f/o lanes *0.5)
    scale_ref: (1, 4H)     post-tanh scale (0.5 on i/f/o lanes, 1.0 on g lanes)
    off_ref:   (1, 4H)     post-tanh offset (0.5 on i/f/o lanes, 0.0 on g lanes)
    wout_ref:  (1, H)      critic head weight row
    bout_ref:  (1,) SMEM   critic head bias scalar
    v_ref:     (T, Bp)     per-step values (written once at the end)
    hn_ref:    (Bp, H)     final hidden state
    cn_ref:    (Bp, H)     final cell state
    gx_scr:    (T*Bp, 4H)  VMEM scratch: hoisted input projections
    y_scr:     (T, Bp, H)  VMEM scratch: per-step hidden states
    """
    Bp, H = h0_ref.shape
    T = y_scr.shape[0]
    H4 = 4 * H

    # ---- Hoisted input projection: one batched matmul for all timesteps. ----
    gx_scr[...] = (
        jnp.dot(x_ref[...], wih_ref[...], preferred_element_type=jnp.float32)
        + b_ref[...])

    # Loop-invariant post-tanh affine constants, broadcast ONCE (not per step).
    scale_b = jnp.broadcast_to(scale_ref[...], (Bp, H4))
    off_b = jnp.broadcast_to(off_ref[...], (Bp, H4))

    def step(t, carry):
        h_prev, c_prev = carry
        row = pl.multiple_of(t * Bp, 8)                  # Bp is a multiple of 8
        # gates: (Bp, 4H), PyTorch gate order [i, f, g, o]; i/f/o lanes hold
        # pre/2 because of the wrapper-side 0.5 column scaling.
        gates = gx_scr[pl.ds(row, Bp), :] + jnp.dot(
            h_prev, whh_ref[...], preferred_element_type=jnp.float32)
        # Single EUP pass over the 128-lane slab; sigmoid lanes recovered with
        # one full-width mul+add on the VPU: sigmoid(x) = 0.5*tanh(x/2) + 0.5.
        t_all = jnp.tanh(gates)
        act = t_all * scale_b + off_b
        i_g = act[:, 0 * H:1 * H]
        f_g = act[:, 1 * H:2 * H]
        g_g = act[:, 2 * H:3 * H]
        o_g = act[:, 3 * H:4 * H]
        c_new = f_g * c_prev + i_g * g_g
        h_new = o_g * jnp.tanh(c_new)
        y_scr[t] = h_new                                 # stash for deferred head
        return h_new, c_new

    unroll_amt = T if T <= 16 else 8                     # cap unroll at long T
    h_n, c_n = lax.fori_loop(0, T, step, (h0_ref[...], c0_ref[...]),
                             unroll=unroll_amt)

    hn_ref[...] = h_n
    cn_ref[...] = c_n

    # ---- Deferred critic head: Linear(H, 1) as VPU multiply + lane reduce. ----
    # output_activation == nn.Identity.
    v_ref[...] = jnp.sum(y_scr[...] * wout_ref[...], axis=-1) + bout_ref[0]


@jax.jit
def ppo_lstm_critic_forward(x, h0, c0, w_ih, w_hh, b_ih, b_hh, w_out, b_out):
    """x: (T,B,D) f32; h0/c0: (1,B,H); torch-shaped weights.

    Returns (values (T,B), (h_n (1,B,H), c_n (1,B,H))).
    """
    T, B, D = x.shape
    H = h0.shape[-1]
    Bp = max(8, ((B + 7) // 8) * 8)                      # sublane-aligned batch

    x32 = x.astype(jnp.float32)
    h0_2d = h0[0].astype(jnp.float32)                    # (B, H)
    c0_2d = c0[0].astype(jnp.float32)
    pad = Bp - B
    if pad:
        x32 = jnp.pad(x32, ((0, 0), (0, pad), (0, 0)))
        h0_2d = jnp.pad(h0_2d, ((0, pad), (0, 0)))
        c0_2d = jnp.pad(c0_2d, ((0, pad), (0, 0)))
    x2d = x32.reshape(T * Bp, D)                         # time-major flatten

    # Glue in plain JAX: transpose weights, fuse gate biases, and fold the
    # sigmoid->tanh rewrite (x/2 input scale) into the i/f/o gate columns.
    col_scale = jnp.concatenate([
        jnp.full((2 * H,), 0.5, jnp.float32),            # i, f  -> sigmoid lanes
        jnp.ones((H,), jnp.float32),                     # g     -> tanh lanes
        jnp.full((H,), 0.5, jnp.float32),                # o     -> sigmoid lanes
    ])
    wih_t = w_ih.T.astype(jnp.float32) * col_scale[None, :]     # (D, 4H)
    whh_t = w_hh.T.astype(jnp.float32) * col_scale[None, :]     # (H, 4H)
    bias = ((b_ih + b_hh).astype(jnp.float32) * col_scale).reshape(1, 4 * H)
    act_scale = col_scale.reshape(1, 4 * H)              # 0.5 on i/f/o, 1.0 on g
    act_off = (1.0 - col_scale).reshape(1, 4 * H)        # 0.5 on i/f/o, 0.0 on g
    wout_row = w_out.reshape(1, H).astype(jnp.float32)   # (1, H)
    bout = b_out.reshape(1).astype(jnp.float32)          # (1,) scalar in SMEM

    v, h_n, c_n = pl.pallas_call(
        _lstm_critic_kernel,
        out_shape=(
            jax.ShapeDtypeStruct((T, Bp), jnp.float32),
            jax.ShapeDtypeStruct((Bp, H), jnp.float32),
            jax.ShapeDtypeStruct((Bp, H), jnp.float32),
        ),
        in_specs=[
            pl.BlockSpec(memory_space=pltpu.MemorySpace.VMEM),   # x2d
            pl.BlockSpec(memory_space=pltpu.MemorySpace.VMEM),   # h0
            pl.BlockSpec(memory_space=pltpu.MemorySpace.VMEM),   # c0
            pl.BlockSpec(memory_space=pltpu.MemorySpace.VMEM),   # w_ih^T (scaled)
            pl.BlockSpec(memory_space=pltpu.MemorySpace.VMEM),   # w_hh^T (scaled)
            pl.BlockSpec(memory_space=pltpu.MemorySpace.VMEM),   # fused gate bias
            pl.BlockSpec(memory_space=pltpu.MemorySpace.VMEM),   # post-tanh scale
            pl.BlockSpec(memory_space=pltpu.MemorySpace.VMEM),   # post-tanh offset
            pl.BlockSpec(memory_space=pltpu.MemorySpace.VMEM),   # w_out row
            pl.BlockSpec(memory_space=pltpu.MemorySpace.SMEM),   # b_out scalar
        ],
        out_specs=(
            pl.BlockSpec(memory_space=pltpu.MemorySpace.VMEM),   # values (T, Bp)
            pl.BlockSpec(memory_space=pltpu.MemorySpace.VMEM),   # h_n
            pl.BlockSpec(memory_space=pltpu.MemorySpace.VMEM),   # c_n
        ),
        scratch_shapes=[
            pltpu.VMEM((T * Bp, 4 * H), jnp.float32),            # hoisted gates_x
            pltpu.VMEM((T, Bp, H), jnp.float32),                 # per-step h_t
        ],
        compiler_params=pltpu.CompilerParams(
            vmem_limit_bytes=32 * 1024 * 1024),
    )(x2d, h0_2d, c0_2d, wih_t, whh_t, bias, act_scale, act_off, wout_row, bout)

    values = v[:, :B]                                    # drop batch padding
    return values, (h_n[None, :B], c_n[None, :B])


def _reference_forward(x, h0, c0, w_ih, w_hh, b_ih, b_hh, w_out, b_out):
    """Pure-JAX reference replicating torch.nn.LSTM + Linear."""
    T, B, D = x.shape
    H = h0.shape[-1]
    h, c = h0[0], c0[0]
    outs = []
    for t in range(T):
        g = x[t] @ w_ih.T + b_ih + h @ w_hh.T + b_hh
        i = jax.nn.sigmoid(g[:, 0 * H:1 * H])
        f = jax.nn.sigmoid(g[:, 1 * H:2 * H])
        gg = jnp.tanh(g[:, 2 * H:3 * H])
        o = jax.nn.sigmoid(g[:, 3 * H:4 * H])
        c = f * c + i * gg
        h = o * jnp.tanh(c)
        outs.append(h)
    y = jnp.stack(outs, axis=0)                          # (T, B, H)
    v = (y @ w_out.T + b_out)[..., 0]                    # identity activation
    return v, (h[None], c[None])


if __name__ == "__main__":
    # Small shapes: seq=8, batch=2, input_dim=8, hidden=32 (4H = 128 lanes).
    T, B, D, H = 8, 2, 8, 32

    key = jax.random.PRNGKey(0)
    ks = jax.random.split(key, 9)
    bound = 1.0 / np.sqrt(H)  # torch default uniform(-1/sqrt(H), 1/sqrt(H))

    x = jax.random.normal(ks[0], (T, B, D), jnp.float32)
    h0 = jax.random.normal(ks[1], (1, B, H), jnp.float32)      # get_init_hidden()
    c0 = jax.random.normal(ks[2], (1, B, H), jnp.float32)

    w_ih = jax.random.uniform(ks[3], (4 * H, D), jnp.float32, -bound, bound)
    w_hh = jax.random.uniform(ks[4], (4 * H, H), jnp.float32, -bound, bound)
    b_ih = jax.random.uniform(ks[5], (4 * H,), jnp.float32, -bound, bound)
    b_hh = jax.random.uniform(ks[6], (4 * H,), jnp.float32, -bound, bound)
    w_out = jax.random.uniform(ks[7], (1, H), jnp.float32, -bound, bound)
    b_out = jax.random.uniform(ks[8], (1,), jnp.float32, -bound, bound)

    values, (h_n, c_n) = ppo_lstm_critic_forward(
        x, h0, c0, w_ih, w_hh, b_ih, b_hh, w_out, b_out)
    jax.block_until_ready((values, h_n, c_n))

    v_ref, (h_ref, c_ref) = _reference_forward(
        x, h0, c0, w_ih, w_hh, b_ih, b_hh, w_out, b_out)

    np.testing.assert_allclose(np.asarray(values), np.asarray(v_ref), rtol=1e-4, atol=1e-5)
    np.testing.assert_allclose(np.asarray(h_n), np.asarray(h_ref), rtol=1e-4, atol=1e-5)
    np.testing.assert_allclose(np.asarray(c_n), np.asarray(c_ref), rtol=1e-4, atol=1e-5)

    assert values.shape == (T, B)
    print("KERNEL_OK")
</pallas_src>

<mosaic_0001>
module attributes {stable_mosaic.version = 11 : i64} {
  func.func @_lstm_critic_kernel(%arg0: memref<64x8xf32, #tpu.memory_space<vmem>>, %arg1: memref<8x32xf32, #tpu.memory_space<vmem>>, %arg2: memref<8x32xf32, #tpu.memory_space<vmem>>, %arg3: memref<8x128xf32, #tpu.memory_space<vmem>>, %arg4: memref<32x128xf32, #tpu.memory_space<vmem>>, %arg5: memref<1x128xf32, #tpu.memory_space<vmem>>, %arg6: memref<1x128xf32, #tpu.memory_space<vmem>>, %arg7: memref<1x128xf32, #tpu.memory_space<vmem>>, %arg8: memref<1x32xf32, #tpu.memory_space<vmem>>, %arg9: memref<1xf32, #tpu.memory_space<smem>>, %arg10: memref<8x8xf32, #tpu.memory_space<vmem>>, %arg11: memref<8x32xf32, #tpu.memory_space<vmem>>, %arg12: memref<8x32xf32, #tpu.memory_space<vmem>>, %arg13: memref<64x128xf32, #tpu.memory_space<vmem>>, %arg14: memref<8x8x32xf32, #tpu.memory_space<vmem>>) attributes {dimension_semantics = [], scalar_prefetch = 0 : i64, scratch_operands = 2 : i64, tpu.core_type = #tpu.core_type<tc>} {
    %c0 = arith.constant 0 : index
    %c0_0 = arith.constant 0 : index
    %0 = vector.load %arg0[%c0, %c0_0] : memref<64x8xf32, #tpu.memory_space<vmem>>, vector<64x8xf32>
    %c0_1 = arith.constant 0 : index
    %c0_2 = arith.constant 0 : index
    %1 = vector.load %arg3[%c0_1, %c0_2] : memref<8x128xf32, #tpu.memory_space<vmem>>, vector<8x128xf32>
    %cst = arith.constant dense<0.000000e+00> : vector<64x128xf32>
    %2 = tpu.matmul %0, %1, %cst {dimension_numbers = #tpu.dot_dimension_numbers<[1], [0], [0], [1], [0, 0, 1, 1], [], []>} : vector<64x8xf32>, vector<8x128xf32>, vector<64x128xf32> -> vector<64x128xf32>
    %c0_3 = arith.constant 0 : index
    %c0_4 = arith.constant 0 : index
    %3 = vector.load %arg5[%c0_3, %c0_4] : memref<1x128xf32, #tpu.memory_space<vmem>>, vector<1x128xf32>
    %4 = vector.broadcast %3 : vector<1x128xf32> to vector<64x128xf32>
    %5 = arith.addf %2, %4 : vector<64x128xf32>
    %c0_5 = arith.constant 0 : index
    %c0_6 = arith.constant 0 : index
    %6 = vector.load %arg13[%c0_5, %c0_6] : memref<64x128xf32, #tpu.memory_space<vmem>>, vector<64x128xf32>
    tpu.vector_store %arg13[%c0_5, %c0_6], %5 {strides = array<i32>} : memref<64x128xf32, #tpu.memory_space<vmem>>, vector<64x128xf32>,
    %c0_7 = arith.constant 0 : index
    %c0_8 = arith.constant 0 : index
    %7 = vector.load %arg6[%c0_7, %c0_8] : memref<1x128xf32, #tpu.memory_space<vmem>>, vector<1x128xf32>
    %8 = vector.shape_cast %7 : vector<1x128xf32> to vector<1x128xf32>
    %9 = vector.broadcast %8 : vector<1x128xf32> to vector<8x128xf32>
    %c0_9 = arith.constant 0 : index
    %c0_10 = arith.constant 0 : index
    %10 = vector.load %arg7[%c0_9, %c0_10] : memref<1x128xf32, #tpu.memory_space<vmem>>, vector<1x128xf32>
    %11 = vector.shape_cast %10 : vector<1x128xf32> to vector<1x128xf32>
    %12 = vector.broadcast %11 : vector<1x128xf32> to vector<8x128xf32>
    %c0_11 = arith.constant 0 : index
    %c0_12 = arith.constant 0 : index
    %13 = vector.load %arg1[%c0_11, %c0_12] : memref<8x32xf32, #tpu.memory_space<vmem>>, vector<8x32xf32>
    %c0_13 = arith.constant 0 : index
    %c0_14 = arith.constant 0 : index
    %14 = vector.load %arg2[%c0_13, %c0_14] : memref<8x32xf32, #tpu.memory_space<vmem>>, vector<8x32xf32>
    %c0_i32 = arith.constant 0 : i32
    %c8_i32 = arith.constant 8 : i32
    %15 = arith.muli %c0_i32, %c8_i32 : i32
    %16 = tpu.assume_multiple %15, 8 : i32
    %17 = arith.index_cast %16 : i32 to index
    %c0_15 = arith.constant 0 : index
    %18 = vector.load %arg13[%17, %c0_15] : memref<64x128xf32, #tpu.memory_space<vmem>>, vector<8x128xf32>
    %c0_16 = arith.constant 0 : index
    %c0_17 = arith.constant 0 : index
    %19 = vector.load %arg4[%c0_16, %c0_17] : memref<32x128xf32, #tpu.memory_space<vmem>>, vector<32x128xf32>
    %cst_18 = arith.constant dense<0.000000e+00> : vector<8x128xf32>
    %20 = tpu.matmul %13, %19, %cst_18 {dimension_numbers = #tpu.dot_dimension_numbers<[1], [0], [0], [1], [0, 0, 1, 1], [], []>} : vector<8x32xf32>, vector<32x128xf32>, vector<8x128xf32> -> vector<8x128xf32>
    %21 = arith.addf %18, %20 : vector<8x128xf32>
    %22 = math.tanh %21 : vector<8x128xf32>
    %23 = arith.mulf %22, %9 : vector<8x128xf32>
    %24 = arith.addf %23, %12 : vector<8x128xf32>
    %25 = vector.extract_strided_slice %24 {offsets = [0, 0], sizes = [8, 32], strides = [1, 1]} : vector<8x128xf32> to vector<8x32xf32>
    %26 = vector.extract_strided_slice %24 {offsets = [0, 32], sizes = [8, 32], strides = [1, 1]} : vector<8x128xf32> to vector<8x32xf32>
    %27 = vector.extract_strided_slice %24 {offsets = [0, 64], sizes = [8, 32], strides = [1, 1]} : vector<8x128xf32> to vector<8x32xf32>
    %28 = vector.extract_strided_slice %24 {offsets = [0, 96], sizes = [8, 32], strides = [1, 1]} : vector<8x128xf32> to vector<8x32xf32>
    %29 = arith.mulf %26, %14 : vector<8x32xf32>
    %30 = arith.mulf %25, %27 : vector<8x32xf32>
    %31 = arith.addf %29, %30 : vector<8x32xf32>
    %32 = math.tanh %31 : vector<8x32xf32>
    %33 = arith.mulf %28, %32 : vector<8x32xf32>
    %34 = arith.index_cast %c0_i32 : i32 to index
    %c0_19 = arith.constant 0 : index
    %c0_20 = arith.constant 0 : index
    %35 = vector.load %arg14[%34, %c0_19, %c0_20] : memref<8x8x32xf32, #tpu.memory_space<vmem>>, vector<1x8x32xf32>
    %36 = vector.shape_cast %35 : vector<1x8x32xf32> to vector<8x32xf32>
    %37 = vector.shape_cast %33 : vector<8x32xf32> to vector<1x8x32xf32>
    tpu.vector_store %arg14[%34, %c0_19, %c0_20], %37 {strides = array<i32>} : memref<8x8x32xf32, #tpu.memory_space<vmem>>, vector<1x8x32xf32>,
    %c1_i32 = arith.constant 1 : i32
    %c8_i32_21 = arith.constant 8 : i32
    %38 = arith.muli %c1_i32, %c8_i32_21 : i32
    %39 = tpu.assume_multiple %38, 8 : i32
    %40 = arith.index_cast %39 : i32 to index
    %c0_22 = arith.constant 0 : index
    %41 = vector.load %arg13[%40, %c0_22] : memref<64x128xf32, #tpu.memory_space<vmem>>, vector<8x128xf32>
    %c0_23 = arith.constant 0 : index
    %c0_24 = arith.constant 0 : index
    %42 = vector.load %arg4[%c0_23, %c0_24] : memref<32x128xf32, #tpu.memory_space<vmem>>, vector<32x128xf32>
    %cst_25 = arith.constant dense<0.000000e+00> : vector<8x128xf32>
    %43 = tpu.matmul %33, %42, %cst_25 {dimension_numbers = #tpu.dot_dimension_numbers<[1], [0], [0], [1], [0, 0, 1, 1], [], []>} : vector<8x32xf32>, vector<32x128xf32>, vector<8x128xf32> -> vector<8x128xf32>
    %44 = arith.addf %41, %43 : vector<8x128xf32>
    %45 = math.tanh %44 : vector<8x128xf32>
    %46 = arith.mulf %45, %9 : vector<8x128xf32>
    %47 = arith.addf %46, %12 : vector<8x128xf32>
    %48 = vector.extract_strided_slice %47 {offsets = [0, 0], sizes = [8, 32], strides = [1, 1]} : vector<8x128xf32> to vector<8x32xf32>
    %49 = vector.extract_strided_slice %47 {offsets = [0, 32], sizes = [8, 32], strides = [1, 1]} : vector<8x128xf32> to vector<8x32xf32>
    %50 = vector.extract_strided_slice %47 {offsets = [0, 64], sizes = [8, 32], strides = [1, 1]} : vector<8x128xf32> to vector<8x32xf32>
    %51 = vector.extract_strided_slice %47 {offsets = [0, 96], sizes = [8, 32], strides = [1, 1]} : vector<8x128xf32> to vector<8x32xf32>
    %52 = arith.mulf %49, %31 : vector<8x32xf32>
    %53 = arith.mulf %48, %50 : vector<8x32xf32>
    %54 = arith.addf %52, %53 : vector<8x32xf32>
    %55 = math.tanh %54 : vector<8x32xf32>
    %56 = arith.mulf %51, %55 : vector<8x32xf32>
    %57 = arith.index_cast %c1_i32 : i32 to index
    %c0_26 = arith.constant 0 : index
    %c0_27 = arith.constant 0 : index
    %58 = vector.load %arg14[%57, %c0_26, %c0_27] : memref<8x8x32xf32, #tpu.memory_space<vmem>>, vector<1x8x32xf32>
    %59 = vector.shape_cast %58 : vector<1x8x32xf32> to vector<8x32xf32>
    %60 = vector.shape_cast %56 : vector<8x32xf32> to vector<1x8x32xf32>
    tpu.vector_store %arg14[%57, %c0_26, %c0_27], %60 {strides = array<i32>} : memref<8x8x32xf32, #tpu.memory_space<vmem>>, vector<1x8x32xf32>,
    %c2_i32 = arith.constant 2 : i32
    %c8_i32_28 = arith.constant 8 : i32
    %61 = arith.muli %c2_i32, %c8_i32_28 : i32
    %62 = tpu.assume_multiple %61, 8 : i32
    %63 = arith.index_cast %62 : i32 to index
    %c0_29 = arith.constant 0 : index
    %64 = vector.load %arg13[%63, %c0_29] : memref<64x128xf32, #tpu.memory_space<vmem>>, vector<8x128xf32>
    %c0_30 = arith.constant 0 : index
    %c0_31 = arith.constant 0 : index
    %65 = vector.load %arg4[%c0_30, %c0_31] : memref<32x128xf32, #tpu.memory_space<vmem>>, vector<32x128xf32>
    %cst_32 = arith.constant dense<0.000000e+00> : vector<8x128xf32>
    %66 = tpu.matmul %56, %65, %cst_32 {dimension_numbers = #tpu.dot_dimension_numbers<[1], [0], [0], [1], [0, 0, 1, 1], [], []>} : vector<8x32xf32>, vector<32x128xf32>, vector<8x128xf32> -> vector<8x128xf32>
    %67 = arith.addf %64, %66 : vector<8x128xf32>
    %68 = math.tanh %67 : vector<8x128xf32>
    %69 = arith.mulf %68, %9 : vector<8x128xf32>
    %70 = arith.addf %69, %12 : vector<8x128xf32>
    %71 = vector.extract_strided_slice %70 {offsets = [0, 0], sizes = [8, 32], strides = [1, 1]} : vector<8x128xf32> to vector<8x32xf32>
    %72 = vector.extract_strided_slice %70 {offsets = [0, 32], sizes = [8, 32], strides = [1, 1]} : vector<8x128xf32> to vector<8x32xf32>
    %73 = vector.extract_strided_slice %70 {offsets = [0, 64], sizes = [8, 32], strides = [1, 1]} : vector<8x128xf32> to vector<8x32xf32>
    %74 = vector.extract_strided_slice %70 {offsets = [0, 96], sizes = [8, 32], strides = [1, 1]} : vector<8x128xf32> to vector<8x32xf32>
    %75 = arith.mulf %72, %54 : vector<8x32xf32>
    %76 = arith.mulf %71, %73 : vector<8x32xf32>
    %77 = arith.addf %75, %76 : vector<8x32xf32>
    %78 = math.tanh %77 : vector<8x32xf32>
    %79 = arith.mulf %74, %78 : vector<8x32xf32>
    %80 = arith.index_cast %c2_i32 : i32 to index
    %c0_33 = arith.constant 0 : index
    %c0_34 = arith.constant 0 : index
    %81 = vector.load %arg14[%80, %c0_33, %c0_34] : memref<8x8x32xf32, #tpu.memory_space<vmem>>, vector<1x8x32xf32>
    %82 = vector.shape_cast %81 : vector<1x8x32xf32> to vector<8x32xf32>
    %83 = vector.shape_cast %79 : vector<8x32xf32> to vector<1x8x32xf32>
    tpu.vector_store %arg14[%80, %c0_33, %c0_34], %83 {strides = array<i32>} : memref<8x8x32xf32, #tpu.memory_space<vmem>>, vector<1x8x32xf32>,
    %c3_i32 = arith.constant 3 : i32
    %c8_i32_35 = arith.constant 8 : i32
    %84 = arith.muli %c3_i32, %c8_i32_35 : i32
    %85 = tpu.assume_multiple %84, 8 : i32
    %86 = arith.index_cast %85 : i32 to index
    %c0_36 = arith.constant 0 : index
    %87 = vector.load %arg13[%86, %c0_36] : memref<64x128xf32, #tpu.memory_space<vmem>>, vector<8x128xf32>
    %c0_37 = arith.constant 0 : index
    %c0_38 = arith.constant 0 : index
    %88 = vector.load %arg4[%c0_37, %c0_38] : memref<32x128xf32, #tpu.memory_space<vmem>>, vector<32x128xf32>
    %cst_39 = arith.constant dense<0.000000e+00> : vector<8x128xf32>
    %89 = tpu.matmul %79, %88, %cst_39 {dimension_numbers = #tpu.dot_dimension_numbers<[1], [0], [0], [1], [0, 0, 1, 1], [], []>} : vector<8x32xf32>, vector<32x128xf32>, vector<8x128xf32> -> vector<8x128xf32>
    %90 = arith.addf %87, %89 : vector<8x128xf32>
    %91 = math.tanh %90 : vector<8x128xf32>
    %92 = arith.mulf %91, %9 : vector<8x128xf32>
    %93 = arith.addf %92, %12 : vector<8x128xf32>
    %94 = vector.extract_strided_slice %93 {offsets = [0, 0], sizes = [8, 32], strides = [1, 1]} : vector<8x128xf32> to vector<8x32xf32>
    %95 = vector.extract_strided_slice %93 {offsets = [0, 32], sizes = [8, 32], strides = [1, 1]} : vector<8x128xf32> to vector<8x32xf32>
    %96 = vector.extract_strided_slice %93 {offsets = [0, 64], sizes = [8, 32], strides = [1, 1]} : vector<8x128xf32> to vector<8x32xf32>
    %97 = vector.extract_strided_slice %93 {offsets = [0, 96], sizes = [8, 32], strides = [1, 1]} : vector<8x128xf32> to vector<8x32xf32>
    %98 = arith.mulf %95, %77 : vector<8x32xf32>
    %99 = arith.mulf %94, %96 : vector<8x32xf32>
    %100 = arith.addf %98, %99 : vector<8x32xf32>
    %101 = math.tanh %100 : vector<8x32xf32>
    %102 = arith.mulf %97, %101 : vector<8x32xf32>
    %103 = arith.index_cast %c3_i32 : i32 to index
    %c0_40 = arith.constant 0 : index
    %c0_41 = arith.constant 0 : index
    %104 = vector.load %arg14[%103, %c0_40, %c0_41] : memref<8x8x32xf32, #tpu.memory_space<vmem>>, vector<1x8x32xf32>
    %105 = vector.shape_cast %104 : vector<1x8x32xf32> to vector<8x32xf32>
    %106 = vector.shape_cast %102 : vector<8x32xf32> to vector<1x8x32xf32>
    tpu.vector_store %arg14[%103, %c0_40, %c0_41], %106 {strides = array<i32>} : memref<8x8x32xf32, #tpu.memory_space<vmem>>, vector<1x8x32xf32>,
    %c4_i32 = arith.constant 4 : i32
    %c8_i32_42 = arith.constant 8 : i32
    %107 = arith.muli %c4_i32, %c8_i32_42 : i32
    %108 = tpu.assume_multiple %107, 8 : i32
    %109 = arith.index_cast %108 : i32 to index
    %c0_43 = arith.constant 0 : index
    %110 = vector.load %arg13[%109, %c0_43] : memref<64x128xf32, #tpu.memory_space<vmem>>, vector<8x128xf32>
    %c0_44 = arith.constant 0 : index
    %c0_45 = arith.constant 0 : index
    %111 = vector.load %arg4[%c0_44, %c0_45] : memref<32x128xf32, #tpu.memory_space<vmem>>, vector<32x128xf32>
    %cst_46 = arith.constant dense<0.000000e+00> : vector<8x128xf32>
    %112 = tpu.matmul %102, %111, %cst_46 {dimension_numbers = #tpu.dot_dimension_numbers<[1], [0], [0], [1], [0, 0, 1, 1], [], []>} : vector<8x32xf32>, vector<32x128xf32>, vector<8x128xf32> -> vector<8x128xf32>
    %113 = arith.addf %110, %112 : vector<8x128xf32>
    %114 = math.tanh %113 : vector<8x128xf32>
    %115 = arith.mulf %114, %9 : vector<8x128xf32>
    %116 = arith.addf %115, %12 : vector<8x128xf32>
    %117 = vector.extract_strided_slice %116 {offsets = [0, 0], sizes = [8, 32], strides = [1, 1]} : vector<8x128xf32> to vector<8x32xf32>
    %118 = vector.extract_strided_slice %116 {offsets = [0, 32], sizes = [8, 32], strides = [1, 1]} : vector<8x128xf32> to vector<8x32xf32>
    %119 = vector.extract_strided_slice %116 {offsets = [0, 64], sizes = [8, 32], strides = [1, 1]} : vector<8x128xf32> to vector<8x32xf32>
    %120 = vector.extract_strided_slice %116 {offsets = [0, 96], sizes = [8, 32], strides = [1, 1]} : vector<8x128xf32> to vector<8x32xf32>
    %121 = arith.mulf %118, %100 : vector<8x32xf32>
    %122 = arith.mulf %117, %119 : vector<8x32xf32>
    %123 = arith.addf %121, %122 : vector<8x32xf32>
    %124 = math.tanh %123 : vector<8x32xf32>
    %125 = arith.mulf %120, %124 : vector<8x32xf32>
    %126 = arith.index_cast %c4_i32 : i32 to index
    %c0_47 = arith.constant 0 : index
    %c0_48 = arith.constant 0 : index
    %127 = vector.load %arg14[%126, %c0_47, %c0_48] : memref<8x8x32xf32, #tpu.memory_space<vmem>>, vector<1x8x32xf32>
    %128 = vector.shape_cast %127 : vector<1x8x32xf32> to vector<8x32xf32>
    %129 = vector.shape_cast %125 : vector<8x32xf32> to vector<1x8x32xf32>
    tpu.vector_store %arg14[%126, %c0_47, %c0_48], %129 {strides = array<i32>} : memref<8x8x32xf32, #tpu.memory_space<vmem>>, vector<1x8x32xf32>,
    %c5_i32 = arith.constant 5 : i32
    %c8_i32_49 = arith.constant 8 : i32
    %130 = arith.muli %c5_i32, %c8_i32_49 : i32
    %131 = tpu.assume_multiple %130, 8 : i32
    %132 = arith.index_cast %131 : i32 to index
    %c0_50 = arith.constant 0 : index
    %133 = vector.load %arg13[%132, %c0_50] : memref<64x128xf32, #tpu.memory_space<vmem>>, vector<8x128xf32>
    %c0_51 = arith.constant 0 : index
    %c0_52 = arith.constant 0 : index
    %134 = vector.load %arg4[%c0_51, %c0_52] : memref<32x128xf32, #tpu.memory_space<vmem>>, vector<32x128xf32>
    %cst_53 = arith.constant dense<0.000000e+00> : vector<8x128xf32>
    %135 = tpu.matmul %125, %134, %cst_53 {dimension_numbers = #tpu.dot_dimension_numbers<[1], [0], [0], [1], [0, 0, 1, 1], [], []>} : vector<8x32xf32>, vector<32x128xf32>, vector<8x128xf32> -> vector<8x128xf32>
    %136 = arith.addf %133, %135 : vector<8x128xf32>
    %137 = math.tanh %136 : vector<8x128xf32>
    %138 = arith.mulf %137, %9 : vector<8x128xf32>
    %139 = arith.addf %138, %12 : vector<8x128xf32>
    %140 = vector.extract_strided_slice %139 {offsets = [0, 0], sizes = [8, 32], strides = [1, 1]} : vector<8x128xf32> to vector<8x32xf32>
    %141 = vector.extract_strided_slice %139 {offsets = [0, 32], sizes = [8, 32], strides = [1, 1]} : vector<8x128xf32> to vector<8x32xf32>
    %142 = vector.extract_strided_slice %139 {offsets = [0, 64], sizes = [8, 32], strides = [1, 1]} : vector<8x128xf32> to vector<8x32xf32>
    %143 = vector.extract_strided_slice %139 {offsets = [0, 96], sizes = [8, 32], strides = [1, 1]} : vector<8x128xf32> to vector<8x32xf32>
    %144 = arith.mulf %141, %123 : vector<8x32xf32>
    %145 = arith.mulf %140, %142 : vector<8x32xf32>
    %146 = arith.addf %144, %145 : vector<8x32xf32>
    %147 = math.tanh %146 : vector<8x32xf32>
    %148 = arith.mulf %143, %147 : vector<8x32xf32>
    %149 = arith.index_cast %c5_i32 : i32 to index
    %c0_54 = arith.constant 0 : index
    %c0_55 = arith.constant 0 : index
    %150 = vector.load %arg14[%149, %c0_54, %c0_55] : memref<8x8x32xf32, #tpu.memory_space<vmem>>, vector<1x8x32xf32>
    %151 = vector.shape_cast %150 : vector<1x8x32xf32> to vector<8x32xf32>
    %152 = vector.shape_cast %148 : vector<8x32xf32> to vector<1x8x32xf32>
    tpu.vector_store %arg14[%149, %c0_54, %c0_55], %152 {strides = array<i32>} : memref<8x8x32xf32, #tpu.memory_space<vmem>>, vector<1x8x32xf32>,
    %c6_i32 = arith.constant 6 : i32
    %c8_i32_56 = arith.constant 8 : i32
    %153 = arith.muli %c6_i32, %c8_i32_56 : i32
    %154 = tpu.assume_multiple %153, 8 : i32
    %155 = arith.index_cast %154 : i32 to index
    %c0_57 = arith.constant 0 : index
    %156 = vector.load %arg13[%155, %c0_57] : memref<64x128xf32, #tpu.memory_space<vmem>>, vector<8x128xf32>
    %c0_58 = arith.constant 0 : index
    %c0_59 = arith.constant 0 : index
    %157 = vector.load %arg4[%c0_58, %c0_59] : memref<32x128xf32, #tpu.memory_space<vmem>>, vector<32x128xf32>
    %cst_60 = arith.constant dense<0.000000e+00> : vector<8x128xf32>
    %158 = tpu.matmul %148, %157, %cst_60 {dimension_numbers = #tpu.dot_dimension_numbers<[1], [0], [0], [1], [0, 0, 1, 1], [], []>} : vector<8x32xf32>, vector<32x128xf32>, vector<8x128xf32> -> vector<8x128xf32>
    %159 = arith.addf %156, %158 : vector<8x128xf32>
    %160 = math.tanh %159 : vector<8x128xf32>
    %161 = arith.mulf %160, %9 : vector<8x128xf32>
    %162 = arith.addf %161, %12 : vector<8x128xf32>
    %163 = vector.extract_strided_slice %162 {offsets = [0, 0], sizes = [8, 32], strides = [1, 1]} : vector<8x128xf32> to vector<8x32xf32>
    %164 = vector.extract_strided_slice %162 {offsets = [0, 32], sizes = [8, 32], strides = [1, 1]} : vector<8x128xf32> to vector<8x32xf32>
    %165 = vector.extract_strided_slice %162 {offsets = [0, 64], sizes = [8, 32], strides = [1, 1]} : vector<8x128xf32> to vector<8x32xf32>
    %166 = vector.extract_strided_slice %162 {offsets = [0, 96], sizes = [8, 32], strides = [1, 1]} : vector<8x128xf32> to vector<8x32xf32>
    %167 = arith.mulf %164, %146 : vector<8x32xf32>
    %168 = arith.mulf %163, %165 : vector<8x32xf32>
    %169 = arith.addf %167, %168 : vector<8x32xf32>
    %170 = math.tanh %169 : vector<8x32xf32>
    %171 = arith.mulf %166, %170 : vector<8x32xf32>
    %172 = arith.index_cast %c6_i32 : i32 to index
    %c0_61 = arith.constant 0 : index
    %c0_62 = arith.constant 0 : index
    %173 = vector.load %arg14[%172, %c0_61, %c0_62] : memref<8x8x32xf32, #tpu.memory_space<vmem>>, vector<1x8x32xf32>
    %174 = vector.shape_cast %173 : vector<1x8x32xf32> to vector<8x32xf32>
    %175 = vector.shape_cast %171 : vector<8x32xf32> to vector<1x8x32xf32>
    tpu.vector_store %arg14[%172, %c0_61, %c0_62], %175 {strides = array<i32>} : memref<8x8x32xf32, #tpu.memory_space<vmem>>, vector<1x8x32xf32>,
    %c7_i32 = arith.constant 7 : i32
    %c8_i32_63 = arith.constant 8 : i32
    %176 = arith.muli %c7_i32, %c8_i32_63 : i32
    %177 = tpu.assume_multiple %176, 8 : i32
    %178 = arith.index_cast %177 : i32 to index
    %c0_64 = arith.constant 0 : index
    %179 = vector.load %arg13[%178, %c0_64] : memref<64x128xf32, #tpu.memory_space<vmem>>, vector<8x128xf32>
    %c0_65 = arith.constant 0 : index
    %c0_66 = arith.constant 0 : index
    %180 = vector.load %arg4[%c0_65, %c0_66] : memref<32x128xf32, #tpu.memory_space<vmem>>, vector<32x128xf32>
    %cst_67 = arith.constant dense<0.000000e+00> : vector<8x128xf32>
    %181 = tpu.matmul %171, %180, %cst_67 {dimension_numbers = #tpu.dot_dimension_numbers<[1], [0], [0], [1], [0, 0, 1, 1], [], []>} : vector<8x32xf32>, vector<32x128xf32>, vector<8x128xf32> -> vector<8x128xf32>
    %182 = arith.addf %179, %181 : vector<8x128xf32>
    %183 = math.tanh %182 : vector<8x128xf32>
    %184 = arith.mulf %183, %9 : vector<8x128xf32>
    %185 = arith.addf %184, %12 : vector<8x128xf32>
    %186 = vector.extract_strided_slice %185 {offsets = [0, 0], sizes = [8, 32], strides = [1, 1]} : vector<8x128xf32> to vector<8x32xf32>
    %187 = vector.extract_strided_slice %185 {offsets = [0, 32], sizes = [8, 32], strides = [1, 1]} : vector<8x128xf32> to vector<8x32xf32>
    %188 = vector.extract_strided_slice %185 {offsets = [0, 64], sizes = [8, 32], strides = [1, 1]} : vector<8x128xf32> to vector<8x32xf32>
    %189 = vector.extract_strided_slice %185 {offsets = [0, 96], sizes = [8, 32], strides = [1, 1]} : vector<8x128xf32> to vector<8x32xf32>
    %190 = arith.mulf %187, %169 : vector<8x32xf32>
    %191 = arith.mulf %186, %188 : vector<8x32xf32>
    %192 = arith.addf %190, %191 : vector<8x32xf32>
    %193 = math.tanh %192 : vector<8x32xf32>
    %194 = arith.mulf %189, %193 : vector<8x32xf32>
    %195 = arith.index_cast %c7_i32 : i32 to index
    %c0_68 = arith.constant 0 : index
    %c0_69 = arith.constant 0 : index
    %196 = vector.load %arg14[%195, %c0_68, %c0_69] : memref<8x8x32xf32, #tpu.memory_space<vmem>>, vector<1x8x32xf32>
    %197 = vector.shape_cast %196 : vector<1x8x32xf32> to vector<8x32xf32>
    %198 = vector.shape_cast %194 : vector<8x32xf32> to vector<1x8x32xf32>
    tpu.vector_store %arg14[%195, %c0_68, %c0_69], %198 {strides = array<i32>} : memref<8x8x32xf32, #tpu.memory_space<vmem>>, vector<1x8x32xf32>,
    %c8_i32_70 = arith.constant 8 : i32
    %c0_71 = arith.constant 0 : index
    %c0_72 = arith.constant 0 : index
    %199 = vector.load %arg11[%c0_71, %c0_72] : memref<8x32xf32, #tpu.memory_space<vmem>>, vector<8x32xf32>
    tpu.vector_store %arg11[%c0_71, %c0_72], %194 {strides = array<i32>} : memref<8x32xf32, #tpu.memory_space<vmem>>, vector<8x32xf32>,
    %c0_73 = arith.constant 0 : index
    %c0_74 = arith.constant 0 : index
    %200 = vector.load %arg12[%c0_73, %c0_74] : memref<8x32xf32, #tpu.memory_space<vmem>>, vector<8x32xf32>
    tpu.vector_store %arg12[%c0_73, %c0_74], %192 {strides = array<i32>} : memref<8x32xf32, #tpu.memory_space<vmem>>, vector<8x32xf32>,
    %c0_75 = arith.constant 0 : index
    %c0_76 = arith.constant 0 : index
    %c0_77 = arith.constant 0 : index
    %201 = vector.load %arg14[%c0_75, %c0_76, %c0_77] : memref<8x8x32xf32, #tpu.memory_space<vmem>>, vector<8x8x32xf32>
    %c0_78 = arith.constant 0 : index
    %c0_79 = arith.constant 0 : index
    %202 = vector.load %arg8[%c0_78, %c0_79] : memref<1x32xf32, #tpu.memory_space<vmem>>, vector<1x32xf32>
    %203 = vector.shape_cast %202 : vector<1x32xf32> to vector<1x1x32xf32>
    %204 = vector.broadcast %203 : vector<1x1x32xf32> to vector<8x8x32xf32>
    %205 = arith.mulf %201, %204 : vector<8x8x32xf32>
    %cst_80 = arith.constant dense<0.000000e+00> : vector<8x8xf32>
    %206 = vector.multi_reduction <add>, %205, %cst_80 [2] : vector<8x8x32xf32> to vector<8x8xf32>
    %c0_81 = arith.constant 0 : index
    %207 = memref.load %arg9[%c0_81] : memref<1xf32, #tpu.memory_space<smem>>
    %208 = vector.broadcast %207 : f32 to vector<8x8xf32>
    %209 = arith.addf %206, %208 : vector<8x8xf32>
    %c0_82 = arith.constant 0 : index
    %c0_83 = arith.constant 0 : index
    %210 = vector.load %arg10[%c0_82, %c0_83] : memref<8x8xf32, #tpu.memory_space<vmem>>, vector<8x8xf32>
    tpu.vector_store %arg10[%c0_82, %c0_83], %209 {strides = array<i32>} : memref<8x8xf32, #tpu.memory_space<vmem>>, vector<8x8xf32>,
    return
  }
}

</mosaic_0001>

<bundles_post_ra>
// kernel: ppo_lstm_critic_forward.1
= control target key start
LH: loop header
LB: loop body
LE: loop exit
PB: predicated region body
PF: predicated region fallthrough
CT: control target
= control target key end

     0   :  { %vm55_vm0 = vcmask 64512   ;;  %v1394_v0 = vmov 0.0   ;;  %vm1395_vm1 = vmmov 0   ;;  %vm214_vm2 = vcmask 261120   ;;  %s1397_s24 = smov 32   ;;  %s1731_s3 = inlined_call_operand.vmem [shape: f32[8,128], index: 3, kind: input, shape index: {}]   ;;  %s1732_s4 = inlined_call_operand.vmem [shape: f32[32,128], index: 4, kind: input, shape index: {}]   ;;  %s1733_s0 = inlined_call_operand.vmem [shape: f32[64,8], index: 0, kind: input, shape index: {}]   ;;  %s1734_s1 = inlined_call_operand.vmem [shape: f32[8,32], index: 1, kind: input, shape index: {}]   ;;  %s1735_s5 = inlined_call_operand.vmem [shape: f32[1,128], index: 5, kind: input, shape index: {}]   ;;  %s1736_s6 = inlined_call_operand.vmem [shape: f32[1,128], index: 6, kind: input, shape index: {}]   ;;  %s1737_s7 = inlined_call_operand.vmem [shape: f32[1,128], index: 7, kind: input, shape index: {}]   ;;  %s1738_s2 = inlined_call_operand.vmem [shape: f32[8,32], index: 2, kind: input, shape index: {}]   ;;  %s1739_s8 = inlined_call_operand.vmem [shape: f32[1,32], index: 8, kind: input, shape index: {}]   ;;  %s1740_s11 = inlined_call_operand.vmem [shape: f32[8,32], index: 11, kind: output, shape index: {1}]   ;;  %s1741_s9 = inlined_call_operand.<no memory space> [shape: f32[1], index: 9, kind: input, shape index: {}]   ;;  %s1742_s12 = inlined_call_operand.vmem [shape: f32[8,32], index: 12, kind: output, shape index: {2}]   ;;  %s1743_s10 = inlined_call_operand.vmem [shape: f32[8,8], index: 10, kind: output, shape index: {0}]  }
   0x1   :  { %1269 = vmatprep.subr.mxu1 %v1394_v0  ;;  %v47_v1 = vld [vmem:[%s1731_s3] sm:$0xff]  ;;  %v1471_v2 = vld [vmem:[%s1732_s4 + $0x18] sm:$0xff]  ;;  %1277 = vmatprep.mubr.msk.f32.mxu1 %vm1395_vm1, %v1394_v0  ;;  %v40_v4 = vld [vmem:[%s1733_s0 + $0x8] sm:$0xff]  ;;  %vm1158_vm3 = vcmask 1041409   ;;  %vm1160_vm4 = vcmask 1042434   ;;  %vm1162_vm5 = vcmask 1043459  }
   0x2   :  { %v39_v3 = vld [vmem:[%s1733_s0] sm:$0xff]  ;;  %1255 = vmatprep.subr.mxu0 %v47_v1  ;;  %1270 = vmatpush3.msra.mxu1 %v1471_v2  ;;  %v1485_v5 = vld [vmem:[%s1732_s4 + $0x10] sm:$0xff]  ;;  %v1493_v6 = vld [vmem:[%s1732_s4 + $0x8] sm:$0xff]  ;;  %vm1164_vm6 = vcmask 1044484   ;;  %vm1166_vm7 = vcmask 1045509   ;;  %vm1168_vm8 = vcmask 1046534  }
   0x3   :  { %1256 = vmatpush3.msra.mxu0 %v47_v1  ;;  %1257 = vmatprep.mubr.msk.f32.mxu0 %vm55_vm0, %v39_v3  ;;  %v1501_v7 = vld [vmem:[%s1732_s4] sm:$0xff]  ;;  %v41_v44 = vld [vmem:[%s1733_s0 + $0x10] sm:$0xff]  ;;  %v42_v45 = vld [vmem:[%s1733_s0 + $0x18] sm:$0xff]  ;;  %vm1170_vm9 = vcmask 1047559  }
   0x4   :  { %1271 = vmatprep.subr.mxu1 %v1394_v0  ;;  %1258 = vmatmul.mubr.msk.f32.vlgmr.msra.gmra.mxu0 %vm55_vm0, %v40_v4  ;;  %v207_v8 = vld [vmem:[%s1734_s1] sm:$0xff]  ;;  %v44_v47 = vld [vmem:[%s1733_s0 + $0x28] sm:$0xff]  ;;  %v45_v48 = vld [vmem:[%s1733_s0 + $0x30] sm:$0xff] }
   0x5   :  { %1272 = vmatpush3.msra.mxu1 %v1485_v5  ;;  %1291 = vmatprep.subr.mxu0 %v1394_v0  ;;  %v1532_v10 = vld [vmem:[%s1735_s5] ss:$0 sm:$0xff]  ;;  %s1396_s5 = smov 64   ;;  %v46_v49 = vld [vmem:[%s1733_s0 + $0x38] sm:$0xff] }
   0x6   :  { %1273 = vmatprep.subr.mxu1 %v1394_v0  ;;  %1292 = vmatpush3.msra.mxu0 %v1471_v2  ;;  %v1538_v16 = vld [vmem:[%s1736_s6] ss:$0 sm:$0xff] }
   0x7   :  { %1274 = vmatpush3.msra.mxu1 %v1493_v6  ;;  %1293 = vmatprep.subr.mxu0 %v1394_v0  ;;  %v1543_v18 = vld [vmem:[%s1737_s7] ss:$0 sm:$0xff] }
   0x8   :  { %1275 = vmatprep.subr.mxu1 %v1394_v0  ;;  %1294 = vmatpush3.msra.mxu0 %v1485_v5  ;;  %v208_v21 = vld [vmem:[%s1738_s2] sm:$0xff] }
   0x9   :  { %1276 = vmatpush3.msra.mxu1 %v1501_v7  ;;  %1295 = vmatprep.subr.mxu0 %v1394_v0  ;;  %v43_v46 = vld [vmem:[%s1733_s0 + $0x20] sm:$0xff] }
   0xa   :  { %1278 = vmatmul.mubr.msk.f32.vlgmr.msra.gmra.mxu1 %vm214_vm2, %v207_v8  ;;  %1280 = vmatprep.subr.mxu1 %v1394_v0 }
   0xb   :  { %1281 = vmatpush3.msra.mxu1 %v1471_v2  ;;  %1288 = vmatprep.mubr.msk.f32.mxu1 %vm1395_vm1, %v1394_v0 }
   0xc   :  { %1282 = vmatprep.subr.mxu1 %v1394_v0  ;;  %1296 = vmatpush3.msra.mxu0 %v1493_v6 }
   0xd   :  { %1283 = vmatpush3.msra.mxu1 %v1485_v5  ;;  %1297 = vmatprep.subr.mxu0 %v1394_v0 }
   0xe   :  { %1284 = vmatprep.subr.mxu1 %v1394_v0  ;;  %1298 = vmatpush3.msra.mxu0 %v1501_v7 }
   0xf   :  { %1285 = vmatpush3.msra.mxu1 %v1493_v6  ;;  %1313 = vmatprep.subr.mxu0 %v1394_v0 }
  0x10   :  { %1286 = vmatprep.subr.mxu1 %v1394_v0  ;;  %1260 = vmatprep.mubr.msk.f32.mxu0 %vm55_vm0, %v41_v44 }
  0x11   :  { %1287 = vmatpush3.msra.mxu1 %v1501_v7  ;;  %1261 = vmatmul.mubr.msk.f32.gmra.mxu0 %vm55_vm0, %v42_v45 }
  0x12   :  { %1302 = vmatprep.subr.mxu1 %v1394_v0  ;;  %1263 = vmatprep.mubr.msk.f32.mxu0 %vm55_vm0, %v43_v46 }
  0x15   :  { %1264 = vmatmul.mubr.msk.f32.gmra.mxu0 %vm55_vm0, %v44_v47 }
  0x16   :  { %1266 = vmatprep.mubr.msk.f32.mxu0 %vm55_vm0, %v45_v48 }
  0x19   :  { %1267 = vmatmul.mubr.msk.f32.gmra.mxu0 %vm55_vm0, %v46_v49 }
  0x1a   :  { %1299 = vmatprep.mubr.msk.f32.mxu0 %vm1395_vm1, %v1394_v0 }
  0xc4   :  { %v1259_v9 = vpop.f32.mrf.mxu0 }
  0xc5   :  { %v152_v32 = vadd.f32 %v1259_v9, %v1532_v10 }
  0xc6   :  { %v146_v11 = vpop.f32.mrf.mxu0 }
  0xc7   :  { %v147_v12 = vadd.f32 %v1532_v10, %v146_v11 }
  0xca   :  { %v284_v13 = vpop.f32.mrf.mxu1 }
  0xcb   :  { %v288_v14 = vadd.f32 %v284_v13, %v147_v12 }
  0xcc   :  { %v1279_v15 = vpop.f32.mrf.mxu1 }
  0xcd   :  { %1362 = vtanh.f32 %v288_v14 }
  0xd1   :  { %v1262_v54 = vpop.f32.mrf.mxu0 }
  0xd3   :  { %v156_v55 = vpop.f32.mrf.mxu0 }
  0xd4   :  { %v157_v60 = vadd.f32 %v1532_v10, %v156_v55 }
  0xd5   :  { %v1612_v56 = vpop.f32.mrf.mxu0 }
  0xd7   :  { %v1614_v57 = vpop.f32.mrf.mxu0 }
  0xd9   :  { %v1616_v58 = vpop.f32.mrf.mxu0 }
  0xda   :  { %v1363_v17 = vpop.eup %1362 }
  0xdb   :  { %v290_v19 = vmul.f32 %v1363_v17, %v1538_v16  ;;  %v1618_v59 = vpop.f32.mrf.mxu0 }
  0xdd   :  { %v291_v20 = vadd.f32 %v1543_v18, %v290_v19 }
  0xdf   :  { %298 = vrot.lane.b32.xlu0 %v291_v20, %s1396_s5 }
  0xe3   :  { %293 = vrot.lane.b32.xlu0 %v208_v21, %s1397_s24 }
 0x151   :  { %v299_v22 = vpop.permute.xlu0 %298 }
 0x152   :  { %v301_v23 = vmul.f32 %v299_v22, %v291_v20 }
 0x154   :  { %303 = vrot.lane.b32.xlu1 %v301_v23, %s1397_s24 }
 0x155   :  { %v294_v24 = vpop.permute.xlu0 %293 }
 0x156   :  { %v296_v25 = vmul.f32 %v294_v24, %v291_v20 }
 0x1c6   :  { %v304_v26 = vpop.permute.xlu1 %303 }
 0x1c7   :  { %v306_v27 = vadd.f32 %v304_v26, %v296_v25 }
 0x1c9   :  { %1364 = vtanh.f32 %v306_v27 }
 0x1d6   :  { %v1365_v28 = vpop.eup %1364 }
 0x1d7   :  { %309 = vrot.lane.b32.xlu1 %v1365_v28, %s1396_s5 }
 0x249   :  { %v310_v29 = vpop.permute.xlu1 %309 }
 0x24a   :  { %v312_v30 = vmul.f32 %v310_v29, %v291_v20  ;;  %v162_v20 = vadd.f32 %v1262_v54, %v1532_v10 }
 0x24c   :  { %314 = vrot.lane.b32.xlu0 %v312_v30, %s1397_s24 }
 0x2be   :  { %v315_v31 = vpop.permute.xlu0 %314 }
 0x2bf   :  { %317 = vst.msk [vmem:[#allocation3] sm:$0xff] %vm214_vm2, %v315_v31  ;;  %1289 = vmatmul.mubr.msk.f32.vlgmr.msra.gmra.mxu1 %vm214_vm2, %v315_v31 }
 0x2c0   :  { %1303 = vmatpush3.msra.mxu1 %v1471_v2  ;;  %1310 = vmatprep.mubr.msk.f32.mxu1 %vm1395_vm1, %v1394_v0 }
 0x2c1   :  { %1304 = vmatprep.subr.mxu1 %v1394_v0 }
 0x2c2   :  { %1305 = vmatpush3.msra.mxu1 %v1485_v5 }
 0x2c3   :  { %1306 = vmatprep.subr.mxu1 %v1394_v0 }
 0x2c4   :  { %1307 = vmatpush3.msra.mxu1 %v1493_v6 }
 0x2c5   :  { %1308 = vmatprep.subr.mxu1 %v1394_v0 }
 0x2c6   :  { %1309 = vmatpush3.msra.mxu1 %v1501_v7 }
 0x2c7   :  { %1324 = vmatprep.subr.mxu1 %v1394_v0 }
 0x37f   :  { %v392_v33 = vpop.f32.mrf.mxu1 }
 0x380   :  { %v396_v34 = vadd.f32 %v392_v33, %v152_v32 }
 0x381   :  { %v1290_v35 = vpop.f32.mrf.mxu1 }
 0x382   :  { %1366 = vtanh.f32 %v396_v34 }
 0x38f   :  { %v1367_v36 = vpop.eup %1366 }
 0x390   :  { %v398_v37 = vmul.f32 %v1367_v36, %v1538_v16  ;;  %v167_v36 = vadd.f32 %v1532_v10, %v1614_v57 }
 0x392   :  { %v399_v38 = vadd.f32 %v1543_v18, %v398_v37 }
 0x394   :  { %402 = vrot.lane.b32.xlu1 %v399_v38, %s1396_s5  ;;  %v400_v41 = vmul.f32 %v399_v38, %v306_v27 }
 0x406   :  { %v403_v39 = vpop.permute.xlu1 %402 }
 0x407   :  { %v405_v40 = vmul.f32 %v403_v39, %v399_v38 }
 0x409   :  { %407 = vrot.lane.b32.xlu0 %v405_v40, %s1397_s24 }
 0x47b   :  { %v408_v42 = vpop.permute.xlu0 %407 }
 0x47c   :  { %v410_v43 = vadd.f32 %v408_v42, %v400_v41 }
 0x47e   :  { %1368 = vtanh.f32 %v410_v43 }
 0x48b   :  { %v1369_v50 = vpop.eup %1368 }
 0x48c   :  { %413 = vrot.lane.b32.xlu1 %v1369_v50, %s1396_s5 }
 0x4fe   :  { %v414_v51 = vpop.permute.xlu1 %413 }
 0x4ff   :  { %v416_v52 = vmul.f32 %v414_v51, %v399_v38 }
 0x501   :  { %418 = vrot.lane.b32.xlu0 %v416_v52, %s1397_s24  ;;  %v172_v52 = vadd.f32 %v1612_v56, %v1532_v10 }
 0x573   :  { %v419_v53 = vpop.permute.xlu0 %418 }
 0x574   :  { %422 = vst.msk [vmem:[#allocation3 + $0x8] sm:$0xff] %vm214_vm2, %v419_v53  ;;  %1300 = vmatmul.mubr.msk.f32.vlgmr.msra.gmra.mxu0 %vm214_vm2, %v419_v53 }
 0x575   :  { %1314 = vmatpush3.msra.mxu0 %v1471_v2  ;;  %1321 = vmatprep.mubr.msk.f32.mxu0 %vm1395_vm1, %v1394_v0 }
 0x576   :  { %1315 = vmatprep.subr.mxu0 %v1394_v0 }
 0x577   :  { %1316 = vmatpush3.msra.mxu0 %v1485_v5 }
 0x578   :  { %1317 = vmatprep.subr.mxu0 %v1394_v0 }
 0x579   :  { %1318 = vmatpush3.msra.mxu0 %v1493_v6 }
 0x57a   :  { %1319 = vmatprep.subr.mxu0 %v1394_v0 }
 0x57b   :  { %1320 = vmatpush3.msra.mxu0 %v1501_v7 }
 0x57c   :  { %1335 = vmatprep.subr.mxu0 %v1394_v0 }
 0x634   :  { %v497_v61 = vpop.f32.mrf.mxu0 }
 0x635   :  { %v501_v62 = vadd.f32 %v497_v61, %v157_v60 }
 0x636   :  { %v1301_v63 = vpop.f32.mrf.mxu0 }
 0x637   :  { %1370 = vtanh.f32 %v501_v62 }
 0x644   :  { %v1371_v1 = vpop.eup %1370 }
 0x645   :  { %v503_v3 = vmul.f32 %v1371_v1, %v1538_v16 }
 0x647   :  { %v504_v4 = vadd.f32 %v1543_v18, %v503_v3  ;;  %v177_v3 = vadd.f32 %v1532_v10, %v1618_v59 }
 0x649   :  { %507 = vrot.lane.b32.xlu1 %v504_v4, %s1396_s5  ;;  %v505_v11 = vmul.f32 %v504_v4, %v410_v43 }
 0x6bb   :  { %v508_v8 = vpop.permute.xlu1 %507 }
 0x6bc   :  { %v510_v9 = vmul.f32 %v508_v8, %v504_v4 }
 0x6be   :  { %512 = vrot.lane.b32.xlu0 %v510_v9, %s1397_s24 }
 0x730   :  { %v513_v12 = vpop.permute.xlu0 %512 }
 0x731   :  { %v515_v13 = vadd.f32 %v513_v12, %v505_v11 }
 0x733   :  { %1372 = vtanh.f32 %v515_v13 }
 0x740   :  { %v1373_v14 = vpop.eup %1372 }
 0x741   :  { %518 = vrot.lane.b32.xlu1 %v1373_v14, %s1396_s5 }
 0x7b3   :  { %v519_v15 = vpop.permute.xlu1 %518 }
 0x7b4   :  { %v521_v17 = vmul.f32 %v519_v15, %v504_v4 }
 0x7b6   :  { %523 = vrot.lane.b32.xlu0 %v521_v17, %s1397_s24 }
 0x828   :  { %v524_v19 = vpop.permute.xlu0 %523 }
 0x829   :  { %527 = vst.msk [vmem:[#allocation3 + $0x10] sm:$0xff] %vm214_vm2, %v524_v19  ;;  %1311 = vmatmul.mubr.msk.f32.vlgmr.msra.gmra.mxu1 %vm214_vm2, %v524_v19 }
 0x82a   :  { %1325 = vmatpush3.msra.mxu1 %v1471_v2  ;;  %1332 = vmatprep.mubr.msk.f32.mxu1 %vm1395_vm1, %v1394_v0 }
 0x82b   :  { %1326 = vmatprep.subr.mxu1 %v1394_v0 }
 0x82c   :  { %1327 = vmatpush3.msra.mxu1 %v1485_v5 }
 0x82d   :  { %1328 = vmatprep.subr.mxu1 %v1394_v0 }
 0x82e   :  { %1329 = vmatpush3.msra.mxu1 %v1493_v6 }
 0x82f   :  { %1330 = vmatprep.subr.mxu1 %v1394_v0 }
 0x830   :  { %1331 = vmatpush3.msra.mxu1 %v1501_v7 }
 0x831   :  { %1346 = vmatprep.subr.mxu1 %v1394_v0 }
 0x8e9   :  { %v602_v21 = vpop.f32.mrf.mxu1 }
 0x8ea   :  { %v606_v22 = vadd.f32 %v602_v21, %v162_v20 }
 0x8eb   :  { %v1312_v23 = vpop.f32.mrf.mxu1 }
 0x8ec   :  { %1374 = vtanh.f32 %v606_v22 }
 0x8f9   :  { %v1375_v24 = vpop.eup %1374 }
 0x8fa   :  { %v608_v25 = vmul.f32 %v1375_v24, %v1538_v16  ;;  %v182_v24 = vadd.f32 %v1616_v58, %v1532_v10  ;;  %v1059_v58 = vld [vmem:[#allocation3] sm:$0xff] }
 0x8fc   :  { %v609_v26 = vadd.f32 %v1543_v18, %v608_v25 }
 0x8fe   :  { %612 = vrot.lane.b32.xlu1 %v609_v26, %s1396_s5  ;;  %v610_v29 = vmul.f32 %v609_v26, %v515_v13 }
 0x970   :  { %v613_v27 = vpop.permute.xlu1 %612 }
 0x971   :  { %v615_v28 = vmul.f32 %v613_v27, %v609_v26 }
 0x973   :  { %617 = vrot.lane.b32.xlu0 %v615_v28, %s1397_s24 }
 0x9e5   :  { %v618_v30 = vpop.permute.xlu0 %617 }
 0x9e6   :  { %v620_v31 = vadd.f32 %v618_v30, %v610_v29 }
 0x9e8   :  { %1376 = vtanh.f32 %v620_v31 }
 0x9f5   :  { %v1377_v32 = vpop.eup %1376 }
 0x9f6   :  { %623 = vrot.lane.b32.xlu1 %v1377_v32, %s1396_s5 }
 0xa68   :  { %v624_v33 = vpop.permute.xlu1 %623 }
 0xa69   :  { %v626_v34 = vmul.f32 %v624_v33, %v609_v26 }
 0xa6b   :  { %628 = vrot.lane.b32.xlu0 %v626_v34, %s1397_s24 }
 0xadd   :  { %v629_v35 = vpop.permute.xlu0 %628 }
 0xade   :  { %632 = vst.msk [vmem:[#allocation3 + $0x18] sm:$0xff] %vm214_vm2, %v629_v35  ;;  %1322 = vmatmul.mubr.msk.f32.vlgmr.msra.gmra.mxu0 %vm214_vm2, %v629_v35 }
 0xadf   :  { %1336 = vmatpush3.msra.mxu0 %v1471_v2  ;;  %1343 = vmatprep.mubr.msk.f32.mxu0 %vm1395_vm1, %v1394_v0 }
 0xae0   :  { %1337 = vmatprep.subr.mxu0 %v1394_v0 }
 0xae1   :  { %1338 = vmatpush3.msra.mxu0 %v1485_v5 }
 0xae2   :  { %1339 = vmatprep.subr.mxu0 %v1394_v0 }
 0xae3   :  { %1340 = vmatpush3.msra.mxu0 %v1493_v6 }
 0xae4   :  { %1341 = vmatprep.subr.mxu0 %v1394_v0 }
 0xae5   :  { %1342 = vmatpush3.msra.mxu0 %v1501_v7 }
 0xb9e   :  { %v707_v37 = vpop.f32.mrf.mxu0 }
 0xb9f   :  { %v711_v38 = vadd.f32 %v707_v37, %v167_v36 }
 0xba0   :  { %v1323_v39 = vpop.f32.mrf.mxu0 }
 0xba1   :  { %1378 = vtanh.f32 %v711_v38 }
 0xbae   :  { %v1379_v40 = vpop.eup %1378 }
 0xbaf   :  { %v713_v41 = vmul.f32 %v1379_v40, %v1538_v16 }
 0xbb1   :  { %v714_v42 = vadd.f32 %v1543_v18, %v713_v41 }
 0xbb3   :  { %717 = vrot.lane.b32.xlu1 %v714_v42, %s1396_s5  ;;  %v715_v45 = vmul.f32 %v714_v42, %v620_v31 }
 0xc25   :  { %v718_v43 = vpop.permute.xlu1 %717 }
 0xc26   :  { %v720_v44 = vmul.f32 %v718_v43, %v714_v42 }
 0xc28   :  { %722 = vrot.lane.b32.xlu0 %v720_v44, %s1397_s24 }
 0xc9a   :  { %v723_v46 = vpop.permute.xlu0 %722 }
 0xc9b   :  { %v725_v47 = vadd.f32 %v723_v46, %v715_v45  ;;  %v1060_v45 = vld [vmem:[#allocation3 + $0x8] sm:$0xff] }
 0xc9d   :  { %1380 = vtanh.f32 %v725_v47 }
 0xcaa   :  { %v1381_v48 = vpop.eup %1380 }
 0xcab   :  { %728 = vrot.lane.b32.xlu1 %v1381_v48, %s1396_s5 }
 0xd1d   :  { %v729_v49 = vpop.permute.xlu1 %728 }
 0xd1e   :  { %v731_v50 = vmul.f32 %v729_v49, %v714_v42 }
 0xd20   :  { %733 = vrot.lane.b32.xlu0 %v731_v50, %s1397_s24 }
 0xd92   :  { %v734_v51 = vpop.permute.xlu0 %733 }
 0xd93   :  { %737 = vst.msk [vmem:[#allocation3 + $0x20] sm:$0xff] %vm214_vm2, %v734_v51  ;;  %1333 = vmatmul.mubr.msk.f32.vlgmr.msra.gmra.mxu1 %vm214_vm2, %v734_v51 }
 0xd94   :  { %1347 = vmatpush3.msra.mxu1 %v1471_v2  ;;  %1354 = vmatprep.mubr.msk.f32.mxu1 %vm1395_vm1, %v1394_v0 }
 0xd95   :  { %1348 = vmatprep.subr.mxu1 %v1394_v0 }
 0xd96   :  { %1349 = vmatpush3.msra.mxu1 %v1485_v5 }
 0xd97   :  { %1350 = vmatprep.subr.mxu1 %v1394_v0 }
 0xd98   :  { %1351 = vmatpush3.msra.mxu1 %v1493_v6 }
 0xd99   :  { %1352 = vmatprep.subr.mxu1 %v1394_v0 }
 0xd9a   :  { %1353 = vmatpush3.msra.mxu1 %v1501_v7  ;;  %v1063_v50 = vld [vmem:[#allocation3 + $0x20] sm:$0xff] }
 0xe53   :  { %v812_v53 = vpop.f32.mrf.mxu1 }
 0xe54   :  { %v816_v2 = vadd.f32 %v812_v53, %v172_v52 }
 0xe55   :  { %v1334_v54 = vpop.f32.mrf.mxu1 }
 0xe56   :  { %1382 = vtanh.f32 %v816_v2 }
 0xe63   :  { %v1383_v55 = vpop.eup %1382 }
 0xe64   :  { %v818_v57 = vmul.f32 %v1383_v55, %v1538_v16 }
 0xe66   :  { %v819_v5 = vadd.f32 %v1543_v18, %v818_v57 }
 0xe68   :  { %822 = vrot.lane.b32.xlu1 %v819_v5, %s1396_s5  ;;  %v820_v0 = vmul.f32 %v819_v5, %v725_v47  ;;  %v1061_v47 = vld [vmem:[#allocation3 + $0x10] sm:$0xff] }
 0xeda   :  { %v823_v60 = vpop.permute.xlu1 %822 }
 0xedb   :  { %v825_v6 = vmul.f32 %v823_v60, %v819_v5 }
 0xedd   :  { %827 = vrot.lane.b32.xlu0 %v825_v6, %s1397_s24 }
 0xf4f   :  { %v828_v7 = vpop.permute.xlu0 %827 }
 0xf50   :  { %v830_v61 = vadd.f32 %v828_v7, %v820_v0  ;;  %v1124_v0 = vlaneseq }
 0xf52   :  { %1384 = vtanh.f32 %v830_v61 }
 0xf5f   :  { %v1385_v56 = vpop.eup %1384 }
 0xf60   :  { %833 = vrot.lane.b32.xlu1 %v1385_v56, %s1396_s5  ;;  %v1127_v56 = vshrl.u32 %v1124_v0, 7 }
 0xfd2   :  { %v834_v62 = vpop.permute.xlu1 %833 }
 0xfd3   :  { %v836_v63 = vmul.f32 %v834_v62, %v819_v5  ;;  %v1107_v62 = vstv %s1741_s9 }
 0xfd5   :  { %838 = vrot.lane.b32.xlu0 %v836_v63, %s1397_s24 }
0x1047   :  { %v839_v1 = vpop.permute.xlu0 %838 }
0x1048   :  { %842 = vst.msk [vmem:[#allocation3 + $0x28] sm:$0xff] %vm214_vm2, %v839_v1  ;;  %1344 = vmatmul.mubr.msk.f32.vlgmr.msra.gmra.mxu0 %vm214_vm2, %v839_v1 }
0x104f   :  { %v1064_v39 = vld [vmem:[#allocation3 + $0x28] sm:$0xff] }
0x1108   :  { %v917_v4 = vpop.f32.mrf.mxu0 }
0x1109   :  { %v921_v8 = vadd.f32 %v917_v4, %v177_v3 }
0x110a   :  { %v1345_v9 = vpop.f32.mrf.mxu0 }
0x110b   :  { %1386 = vtanh.f32 %v921_v8 }
0x1118   :  { %v1387_v11 = vpop.eup %1386 }
0x1119   :  { %v923_v12 = vmul.f32 %v1387_v11, %v1538_v16 }
0x111b   :  { %v924_v13 = vadd.f32 %v1543_v18, %v923_v12 }
0x111d   :  { %927 = vrot.lane.b32.xlu1 %v924_v13, %s1396_s5  ;;  %v925_v17 = vmul.f32 %v924_v13, %v830_v61  ;;  %v1125_v61 = vand.u32 127, %v1124_v0 }
0x111f   :  { %v1128_v4 = vsub.s32 %v1125_v61, %v1127_v56 }
0x118f   :  { %v928_v14 = vpop.permute.xlu1 %927 }
0x1190   :  { %v930_v15 = vmul.f32 %v928_v14, %v924_v13 }
0x1192   :  { %932 = vrot.lane.b32.xlu0 %v930_v15, %s1397_s24 }
0x1204   :  { %v933_v19 = vpop.permute.xlu0 %932 }
0x1205   :  { %v935_v20 = vadd.f32 %v933_v19, %v925_v17 }
0x1207   :  { %1388 = vtanh.f32 %v935_v20 }
0x1214   :  { %v1389_v59 = vpop.eup %1388 }
0x1215   :  { %938 = vrot.lane.b32.xlu1 %v1389_v59, %s1396_s5 }
0x1287   :  { %v939_v21 = vpop.permute.xlu1 %938 }
0x1288   :  { %v941_v22 = vmul.f32 %v939_v21, %v924_v13 }
0x128a   :  { %943 = vrot.lane.b32.xlu0 %v941_v22, %s1397_s24 }
0x12fc   :  { %v944_v23 = vpop.permute.xlu0 %943 }
0x12fd   :  { %947 = vst.msk [vmem:[#allocation3 + $0x30] sm:$0xff] %vm214_vm2, %v944_v23  ;;  %1355 = vmatmul.mubr.msk.f32.vlgmr.msra.gmra.mxu1 %vm214_vm2, %v944_v23 }
0x1304   :  { %v1065_v53 = vld [vmem:[#allocation3 + $0x30] sm:$0xff] }
0x13bd   :  { %v1022_v25 = vpop.f32.mrf.mxu1 }
0x13be   :  { %v1026_v26 = vadd.f32 %v1022_v25, %v182_v24 }
0x13bf   :  { %v1356_v27 = vpop.f32.mrf.mxu1 }
0x13c0   :  { %1390 = vtanh.f32 %v1026_v26 }
0x13cd   :  { %v1391_v28 = vpop.eup %1390 }
0x13ce   :  { %v1028_v29 = vmul.f32 %v1391_v28, %v1538_v16  ;;  %v1205_v16 = vld [vmem:[%s1739_s8] ss:$0 sm:$0xff]  ;;  %s1398_s8 = smov 96  }
0x13cf   :  { %v1074_v36 = vmul.f32 %v1205_v16, %v1059_v58  ;;  %v1079_v41 = vmul.f32 %v1205_v16, %v1064_v39  ;;  %v1075_v46 = vmul.f32 %v1205_v16, %v1060_v45  ;;  %v1076_v49 = vmul.f32 %v1205_v16, %v1061_v47 }
0x13d0   :  { %v1029_v30 = vadd.f32 %v1543_v18, %v1028_v29  ;;  %v1062_v18 = vld [vmem:[#allocation3 + $0x18] sm:$0xff]  ;;  %v1078_v52 = vmul.f32 %v1205_v16, %v1063_v50  ;;  %v1080_v54 = vmul.f32 %v1205_v16, %v1065_v53 }
0x13d1   :  { %v1082_v37 = vsel %vm214_vm2, %v1074_v36, 0.0  ;;  %v1077_v38 = vmul.f32 %v1205_v16, %v1062_v18  ;;  %v1097_v42 = vsel %vm214_vm2, %v1079_v41, 0.0  ;;  %v1085_v48 = vsel %vm214_vm2, %v1075_v46, 0.0 }
0x13d2   :  { %1032 = vrot.lane.b32.xlu1 %v1029_v30, %s1396_s5  ;;  %v1030_v33 = vmul.f32 %v1029_v30, %v935_v20  ;;  %v1088_v51 = vsel %vm214_vm2, %v1076_v49, 0.0  ;;  %v1094_v2 = vsel %vm214_vm2, %v1078_v52, 0.0  ;;  %v1100_v55 = vsel %vm214_vm2, %v1080_v54, 0.0 }
0x13d3   :  { %v1091_v40 = vsel %vm214_vm2, %v1077_v38, 0.0 }
0x1444   :  { %v1033_v31 = vpop.permute.xlu1 %1032 }
0x1445   :  { %v1035_v32 = vmul.f32 %v1033_v31, %v1029_v30 }
0x1447   :  { %1037 = vrot.lane.b32.xlu0 %v1035_v32, %s1397_s24 }
0x14b9   :  { %v1038_v34 = vpop.permute.xlu0 %1037 }
0x14ba   :  { %v1040_v35 = vadd.f32 %v1038_v34, %v1030_v33 }
0x14bc   :  { %1392 = vtanh.f32 %v1040_v35 }
0x14c9   :  { %v1393_v10 = vpop.eup %1392 }
0x14ca   :  { %1043 = vrot.lane.b32.xlu1 %v1393_v10, %s1396_s5 }
0x14ee   :  { %1083 = vadd.xlane.f32.xlu1 %v1082_v37 }
0x14f2   :  { %1092 = vadd.xlane.f32.xlu1 %v1091_v40 }
0x14f6   :  { %1098 = vadd.xlane.f32.xlu1 %v1097_v42 }
0x153c   :  { %v1044_v43 = vpop.permute.xlu1 %1043 }
0x153d   :  { %v1046_v44 = vmul.f32 %v1044_v43, %v1029_v30 }
0x153f   :  { %1048 = vrot.lane.b32.xlu0 %v1046_v44, %s1397_s24 }
0x155e   :  { %1086 = vadd.xlane.f32.xlu0 %v1085_v48 }
0x1562   :  { %1089 = vadd.xlane.f32.xlu0 %v1088_v51 }
0x1566   :  { %1095 = vadd.xlane.f32.xlu0 %v1094_v2 }
0x156a   :  { %1101 = vadd.xlane.f32.xlu0 %v1100_v55 }
0x1577   :  { %v1084_v7 = vpop.xlane.xlu1 %1083 }
0x1578   :  { %v1108_v8 = vadd.f32 %v1107_v62, %v1084_v7 }
0x157a   :  { %v1129_v13 = vrot.slane %v1108_v8, %v1128_v4 }
0x157b   :  { %v1093_v1 = vpop.xlane.xlu1 %1092 }
0x157c   :  { %v1111_v14 = vadd.f32 %v1107_v62, %v1093_v1 }
0x157e   :  { %v1141_v22 = vrot.slane %v1111_v14, %v1128_v4 }
0x157f   :  { %v1099_v15 = vpop.xlane.xlu1 %1098 }
0x1580   :  { %1055 = vrot.lane.b32.xlu0 %v1040_v35, %s1398_s8  ;;  %v1113_v23 = vadd.f32 %v1107_v62, %v1099_v15 }
0x1582   :  { %v1149_v29 = vrot.slane %v1113_v23, %v1128_v4 }
0x15b1   :  { %v1049_v57 = vpop.permute.xlu0 %1048 }
0x15b2   :  { %1052 = vst.msk [vmem:[#allocation3 + $0x38] sm:$0xff] %vm214_vm2, %v1049_v57  ;;  %1053 = vst.msk [vmem:[%s1740_s11] sm:$0xff] %vm214_vm2, %v1049_v57 }
0x15b9   :  { %v1066_v5 = vld [vmem:[#allocation3 + $0x38] sm:$0xff] }
0x15ba   :  { %v1081_v60 = vmul.f32 %v1205_v16, %v1066_v5 }
0x15bc   :  { %v1103_v6 = vsel %vm214_vm2, %v1081_v60, 0.0 }
0x15bd   :  { %1104 = vadd.xlane.f32.xlu1 %v1103_v6 }
0x15e7   :  { %v1087_v63 = vpop.xlane.xlu0 %1086 }
0x15e8   :  { %v1109_v3 = vadd.f32 %v1107_v62, %v1087_v63 }
0x15ea   :  { %v1133_v9 = vrot.slane %v1109_v3, %v1128_v4 }
0x15eb   :  { %v1090_v11 = vpop.xlane.xlu0 %1089 }
0x15ec   :  { %v1110_v12 = vadd.f32 %v1107_v62, %v1090_v11  ;;  %v1159_v19 = vsel %vm1158_vm3, %v1133_v9, %v1129_v13 }
0x15ee   :  { %v1137_v17 = vrot.slane %v1110_v12, %v1128_v4 }
0x15ef   :  { %v1096_v20 = vpop.xlane.xlu0 %1095 }
0x15f0   :  { %v1161_v59 = vsel %vm1160_vm4, %v1137_v17, %v1159_v19  ;;  %v1112_v21 = vadd.f32 %v1107_v62, %v1096_v20 }
0x15f1   :  { %v1163_v25 = vsel %vm1162_vm5, %v1141_v22, %v1161_v59 }
0x15f2   :  { %v1145_v24 = vrot.slane %v1112_v21, %v1128_v4 }
0x15f3   :  { %v1102_v26 = vpop.xlane.xlu0 %1101 }
0x15f4   :  { %v1165_v27 = vsel %vm1164_vm6, %v1145_v24, %v1163_v25  ;;  %v1114_v28 = vadd.f32 %v1107_v62, %v1102_v26 }
0x15f5   :  { %v1167_v31 = vsel %vm1166_vm7, %v1149_v29, %v1165_v27 }
0x15f6   :  { %v1153_v30 = vrot.slane %v1114_v28, %v1128_v4 }
0x15f7   :  { %v1056_v32 = vpop.permute.xlu0 %1055 }
0x15f8   :  { %v1169_v33 = vsel %vm1168_vm8, %v1153_v30, %v1167_v31  ;;  %1058 = vst.msk [vmem:[%s1742_s12] sm:$0xff] %vm214_vm2, %v1056_v32 }
0x1646   :  { %v1105_v34 = vpop.xlane.xlu1 %1104 }
0x1647   :  { %v1115_v35 = vadd.f32 %v1107_v62, %v1105_v34 }
0x1649   :  { %v1157_v10 = vrot.slane %v1115_v35, %v1128_v4 }
0x164b   :  { %v1171_v58 = vsel %vm1170_vm9, %v1157_v10, %v1169_v33 }
0x164c   :  { %1173 = vst.msk [vmem:[%s1743_s10] sm:$0xff] %vm55_vm0, %v1171_v58 }

</bundles_post_ra>
